<compile_context>
chip_gen: v7x
topology: tpu7x:2x2x1
jax: 0.10.0
libtpu: 0.0.40
codegen_flags: <defaults>
</compile_context>

<pallas_src>
import jax
import jax.numpy as jnp
from jax.experimental import pallas as pl
from jax.experimental.pallas import tpu as pltpu


def _round_up(x, m):
    return ((x + m - 1) // m) * m


def _cross_interaction_kernel(x0_ref, xi_ref, w_ref, b_ref, o_ref):
    # x0_ref, xi_ref, o_ref : (tile_b, D_blk)   w_ref, b_ref : (1, D_blk)
    xi = xi_ref[...].astype(jnp.float32)
    w = w_ref[...].astype(jnp.float32)
    # Row-wise dot against the (1, D) weight: VPU mul + XLU lane reduce,
    # accumulated in f32.  Hides comfortably under the HBM-bound DMA.
    s = jnp.sum(xi * w, axis=-1, keepdims=True)          # (tile_b, 1) f32

    x0 = x0_ref[...].astype(jnp.float32)
    b = b_ref[...].astype(jnp.float32)
    o_ref[...] = (s * x0 + b).astype(o_ref.dtype)


def cross_interaction(x0, xi, weight, bias, *, tile_b=None):
    """weight: (1, D) (torch Linear(input_dim, 1).weight), bias: (D,)."""
    B, D = x0.shape
    assert xi.shape == (B, D)
    assert weight.shape == (1, D)
    assert bias.shape == (D,)

    out_dtype = x0.dtype
    itemsize = jnp.dtype(out_dtype).itemsize
    pack = max(8, 32 // itemsize)       # sublane packing: 8 f32 / 16 bf16 / 32 int8

    # Feature dim: pad to 128 only when D < 128 (narrow masked stores are the
    # expensive case).  Otherwise keep full-D blocks (full-array-dim exception).
    if D < 128:
        D_blk = 128
        pad_d = D_blk - D
    else:
        D_blk = D
        pad_d = 0

    if pad_d:
        x0_in = jnp.pad(x0, ((0, 0), (0, pad_d)))
        xi_in = jnp.pad(xi, ((0, 0), (0, pad_d)))
        w2d = jnp.pad(weight.reshape(1, D), ((0, 0), (0, pad_d)))
        b2d = jnp.pad(bias.reshape(1, D), ((0, 0), (0, pad_d)))
    else:
        x0_in, xi_in = x0, xi
        w2d = weight.reshape(1, D)
        b2d = bias.reshape(1, D)

    if tile_b is None:
        # ~24 MiB tile budget: 3 (tile_b, D_blk) arrays x 2 pipeline buffers.
        budget = 24 * 1024 * 1024
        tb = budget // (6 * D_blk * itemsize)
        tb = max(pack, (tb // pack) * pack)
        tb = min(tb, 4096)
        # Prefer >= ~4 grid steps (pipelining + both v7x TensorCores busy).
        b_ceil = _round_up(B, pack)
        target = max(pack, _round_up(pl.cdiv(b_ceil, 4), pack))
        tile_b = max(pack, min(tb, target))
    else:
        tile_b = max(pack, (int(tile_b) // pack) * pack)

    grid = (pl.cdiv(B, tile_b),)

    cost = pl.CostEstimate(
        flops=3 * B * D,
        transcendentals=0,
        bytes_accessed=3 * B * D * itemsize,
    )

    out = pl.pallas_call(
        _cross_interaction_kernel,
        out_shape=jax.ShapeDtypeStruct((B, D_blk), out_dtype),
        grid_spec=pltpu.PrefetchScalarGridSpec(
            num_scalar_prefetch=0,
            grid=grid,
            in_specs=[
                pl.BlockSpec((tile_b, D_blk), lambda i: (i, 0)),  # X_0
                pl.BlockSpec((tile_b, D_blk), lambda i: (i, 0)),  # X_i
                pl.BlockSpec((1, D_blk), lambda i: (0, 0)),       # weight (invariant)
                pl.BlockSpec((1, D_blk), lambda i: (0, 0)),       # bias   (invariant)
            ],
            out_specs=pl.BlockSpec((tile_b, D_blk), lambda i: (i, 0)),
        ),
        compiler_params=pltpu.CompilerParams(
            dimension_semantics=("parallel",),
            vmem_limit_bytes=32 * 1024 * 1024,
        ),
        cost_estimate=cost,
    )(x0_in, xi_in, w2d, b2d)

    if pad_d:
        return out[:, :D]
    return out


def cross_interaction_ref(x0, xi, weight, bias):
    # Pure-JAX reference mirroring the PyTorch module.
    s = xi @ weight.T  # (B, 1)
    return s * x0 + bias[None, :]


if __name__ == "__main__":
    key = jax.random.PRNGKey(0)
    k0, k1, kw = jax.random.split(key, 3)

    # Small primary test (matches the module's expected usage).
    batch, input_dim = 8, 32
    x0 = jax.random.normal(k0, (batch, input_dim), dtype=jnp.float32)
    xi = jax.random.normal(k1, (batch, input_dim), dtype=jnp.float32)

    # torch Linear default init is U(-1/sqrt(D), 1/sqrt(D)); bias is zeros.
    bound = 1.0 / jnp.sqrt(jnp.float32(input_dim))
    weight = jax.random.uniform(
        kw, (1, input_dim), dtype=jnp.float32, minval=-bound, maxval=bound
    )
    bias = jnp.zeros((input_dim,), dtype=jnp.float32)

    out = jax.block_until_ready(cross_interaction(x0, xi, weight, bias))
    ref = cross_interaction_ref(x0, xi, weight, bias)
    assert out.shape == (batch, input_dim)
    assert jnp.allclose(out, ref, atol=1e-5, rtol=1e-5), "mismatch vs reference (small)"

    # Second check: ragged batch (not a tile multiple) + non-128-multiple
    # features >= 128 -> exercises the no-pad masked-tail / ragged-block path.
    b2, d2 = 300, 200
    kk = jax.random.split(jax.random.PRNGKey(1), 4)
    x0b = jax.random.normal(kk[0], (b2, d2), dtype=jnp.float32)
    xib = jax.random.normal(kk[1], (b2, d2), dtype=jnp.float32)
    wb = jax.random.normal(kk[2], (1, d2), dtype=jnp.float32) * 0.05
    bb = jax.random.normal(kk[3], (d2,), dtype=jnp.float32) * 0.1
    out2 = jax.block_until_ready(cross_interaction(x0b, xib, wb, bb, tile_b=128))
    ref2 = cross_interaction_ref(x0b, xib, wb, bb)
    assert out2.shape == (b2, d2)
    assert jnp.allclose(out2, ref2, atol=1e-4, rtol=1e-4), "mismatch vs reference (tiled)"

    print("KERNEL_OK")
</pallas_src>

<mosaic_0001>
module attributes {stable_mosaic.version = 11 : i64} {
  func.func @_cross_interaction_kernel(%arg0: i32, %arg1: memref<8x128xf32, #tpu.memory_space<vmem>>, %arg2: memref<8x128xf32, #tpu.memory_space<vmem>>, %arg3: memref<1x128xf32, #tpu.memory_space<vmem>>, %arg4: memref<1x128xf32, #tpu.memory_space<vmem>>, %arg5: memref<8x128xf32, #tpu.memory_space<vmem>>) attributes {dimension_semantics = [#tpu.dimension_semantics<parallel>], iteration_bounds = array<i64: 1>, scalar_prefetch = 0 : i64, scratch_operands = 0 : i64, tpu.core_type = #tpu.core_type<tc>, window_params = [{transform_indices = @transform_0, window_bounds = array<i64: 8, 128>}, {transform_indices = @transform_1, window_bounds = array<i64: 8, 128>}, {pipeline_mode = #tpu.pipeline_mode<synchronous>, transform_indices = @transform_2, window_bounds = array<i64: 1, 128>}, {pipeline_mode = #tpu.pipeline_mode<synchronous>, transform_indices = @transform_3, window_bounds = array<i64: 1, 128>}, {transform_indices = @transform_4, window_bounds = array<i64: 8, 128>}]} {
    %c0 = arith.constant 0 : index
    %c0_0 = arith.constant 0 : index
    %0 = vector.load %arg2[%c0, %c0_0] : memref<8x128xf32, #tpu.memory_space<vmem>>, vector<8x128xf32>
    %c0_1 = arith.constant 0 : index
    %c0_2 = arith.constant 0 : index
    %1 = vector.load %arg3[%c0_1, %c0_2] : memref<1x128xf32, #tpu.memory_space<vmem>>, vector<1x128xf32>
    %2 = vector.broadcast %1 : vector<1x128xf32> to vector<8x128xf32>
    %3 = arith.mulf %0, %2 : vector<8x128xf32>
    %cst = arith.constant dense<0.000000e+00> : vector<8xf32>
    %4 = vector.multi_reduction <add>, %3, %cst [1] : vector<8x128xf32> to vector<8xf32>
    %5 = vector.shape_cast %4 : vector<8xf32> to vector<8x1xf32>
    %c0_3 = arith.constant 0 : index
    %c0_4 = arith.constant 0 : index
    %6 = vector.load %arg1[%c0_3, %c0_4] : memref<8x128xf32, #tpu.memory_space<vmem>>, vector<8x128xf32>
    %c0_5 = arith.constant 0 : index
    %c0_6 = arith.constant 0 : index
    %7 = vector.load %arg4[%c0_5, %c0_6] : memref<1x128xf32, #tpu.memory_space<vmem>>, vector<1x128xf32>
    %8 = vector.broadcast %5 : vector<8x1xf32> to vector<8x128xf32>
    %9 = arith.mulf %8, %6 : vector<8x128xf32>
    %10 = vector.broadcast %7 : vector<1x128xf32> to vector<8x128xf32>
    %11 = arith.addf %9, %10 : vector<8x128xf32>
    %c0_7 = arith.constant 0 : index
    %c0_8 = arith.constant 0 : index
    %12 = vector.load %arg5[%c0_7, %c0_8] : memref<8x128xf32, #tpu.memory_space<vmem>>, vector<8x128xf32>
    tpu.vector_store %arg5[%c0_7, %c0_8], %11 {strides = array<i32>} : memref<8x128xf32, #tpu.memory_space<vmem>>, vector<8x128xf32>,
    return
  }
  func.func @transform_0(%arg0: i32) -> (i32, i32) {
    %c0_i32 = arith.constant 0 : i32
    %c0_i32_0 = arith.constant 0 : i32
    return %arg0, %c0_i32 : i32, i32
  }
  func.func @transform_1(%arg0: i32) -> (i32, i32) {
    %c0_i32 = arith.constant 0 : i32
    %c0_i32_0 = arith.constant 0 : i32
    return %arg0, %c0_i32 : i32, i32
  }
  func.func @transform_2(%arg0: i32) -> (i32, i32) {
    %c0_i32 = arith.constant 0 : i32
    %c0_i32_0 = arith.constant 0 : i32
    %c0_i32_1 = arith.constant 0 : i32
    return %c0_i32, %c0_i32_0 : i32, i32
  }
  func.func @transform_3(%arg0: i32) -> (i32, i32) {
    %c0_i32 = arith.constant 0 : i32
    %c0_i32_0 = arith.constant 0 : i32
    %c0_i32_1 = arith.constant 0 : i32
    return %c0_i32, %c0_i32_0 : i32, i32
  }
  func.func @transform_4(%arg0: i32) -> (i32, i32) {
    %c0_i32 = arith.constant 0 : i32
    %c0_i32_0 = arith.constant 0 : i32
    return %arg0, %c0_i32 : i32, i32
  }
}

</mosaic_0001>

<bundles_post_ra>
// kernel: tpu_custom_call.1
= control target key start
LH: loop header
LB: loop body
LE: loop exit
PB: predicated region body
PF: predicated region fallthrough
CT: control target
= control target key end

     0   :  { %9 = vsyncpa [#allocation3], 0  ;;  %s227_s0 = inlined_call_operand.hbm [shape: f32[8,128], index: 0, kind: input, shape index: {}]   ;;  %s228_s1 = inlined_call_operand.hbm [shape: f32[8,128], index: 1, kind: input, shape index: {}]   ;;  %s229_s2 = inlined_call_operand.vmem [shape: f32[1,128], index: 2, kind: input, shape index: {}]   ;;  %s230_s3 = inlined_call_operand.vmem [shape: f32[1,128], index: 3, kind: input, shape index: {}]   ;;  %s231_s4 = inlined_call_operand.hbm [shape: f32[8,128], index: 4, kind: output, shape index: {}]  }
   0x1   :  { %10 = vsyncpa [#allocation6], 0 }
   0x2   :  { %11 = vsyncpa [#allocation4], 0  ;;  %s157_s15 = smov [#allocation2]   ;;  %s158_s17 = smov [#allocation5]  }
   0x3   :  { %s18_s16 = sshll.u32 %s157_s15, 4  ;;  %s28_s18 = sshll.u32 %s158_s17, 4  ;;  %s19_s16 = int_to_ptr.vmem [resolvable:$true] %s18_s16  ;;  %s29_s18 = int_to_ptr.vmem [resolvable:$true] %s28_s18 }
   0x4   :  { %s85_s21 = scalar_lea.hbm %s227_s0, 128 }
   0x5   :  { %p86_p0 = scmp.ne.s32.totalorder %s227_s0, %s85_s21  ;;  %p89_p1 = scmp.lt.u32.totalorder %s85_s21, %s227_s0 }
   0x7   :  { %p91_p2 = pnand %p89_p1, %p86_p0 }
   0x9   :  { %94 = shalt.err (!%p91_p2)
}
   0xa   :  { %s95_s26 = scalar_lea.vmem %s19_s16, 128  ;;  %p100_p4 = scmp.lt.s32.totalorder %s19_s16, %s19_s16 }
   0xb   :  { %p96_p3 = scmp.ne.s32.totalorder %s19_s16, %s95_s26  ;;  %p101_p5 = scmp.lt.s32.totalorder %s95_s26, %s95_s26 }
   0xd   :  { %p102_p6 = por %p101_p5, %p100_p4 }
   0xf   :  { %p103_p7 = pnand %p102_p6, %p96_p3 }
  0x11   :  { %106 = shalt.err (!%p103_p7)
}
  0x12   :  { %21 = dma.hbm_to_vmem [thread:$0]  %s227_s0, 128, %s19_s16, [#allocation3]  }
  0x13   :  { %s107_s5 = scalar_lea.hbm %s228_s1, 128 }
  0x14   :  { %p108_p8 = scmp.ne.s32.totalorder %s228_s1, %s107_s5  ;;  %p111_p9 = scmp.lt.u32.totalorder %s107_s5, %s228_s1 }
  0x16   :  { %p113_p10 = pnand %p111_p9, %p108_p8 }
  0x18   :  { %116 = shalt.err (!%p113_p10)
}
  0x19   :  { %s117_s10 = scalar_lea.vmem %s29_s18, 128  ;;  %p122_p12 = scmp.lt.s32.totalorder %s29_s18, %s29_s18 }
  0x1a   :  { %p118_p11 = scmp.ne.s32.totalorder %s29_s18, %s117_s10  ;;  %p123_p13 = scmp.lt.s32.totalorder %s117_s10, %s117_s10 }
  0x1c   :  { %p124_p0 = por %p123_p13, %p122_p12 }
  0x1e   :  { %p125_p1 = pnand %p124_p0, %p118_p11 }
  0x20   :  { %128 = shalt.err (!%p125_p1)
}
  0x21   :  { %31 = dma.hbm_to_vmem [thread:$0]  %s228_s1, 128, %s29_s18, [#allocation6]  }
  0x22   :  { %151 = dma.done.wait [#allocation3], 128  }
  0x23   :  { %152 = vsyncadd [#allocation3], 4294967168 }
  0x24   :  { %153 = dma.done.wait [#allocation6], 128  }
  0x25   :  { %154 = vsyncadd [#allocation6], 4294967168  ;;  %v42_v0 = vld [vmem:[#allocation5] sm:$0xff]  ;;  %v80_v1 = vld [vmem:[%s229_s2] ss:$0 sm:$0xff]  ;;  %s159_s16 = smov [#allocation7]  }
  0x26   :  { %v50_v2 = vmul.f32 %v80_v1, %v42_v0  ;;  %v53_v3 = vld [vmem:[#allocation2] sm:$0xff]  ;;  %s70_s17 = sshll.u32 %s159_s16, 4  ;;  %s71_s17 = int_to_ptr.vmem [resolvable:$true] %s70_s17 }
  0x27   :  { %v81_v5 = vld [vmem:[%s230_s3] ss:$0 sm:$0xff]  ;;  %s129_s1 = scalar_lea.vmem %s71_s17, 128  ;;  %p134_p3 = scmp.lt.s32.totalorder %s71_s17, %s71_s17 }
  0x28   :  { %51 = vadd.xlane.f32.xlu0 %v50_v2  ;;  %p130_p2 = scmp.ne.s32.totalorder %s71_s17, %s129_s1  ;;  %p135_p4 = scmp.lt.s32.totalorder %s129_s1, %s129_s1 }
  0x2a   :  { %p136_p5 = por %p135_p4, %p134_p3 }
  0x2c   :  { %p137_p6 = pnand %p136_p5, %p130_p2 }
  0xb5   :  { %v52_v4 = vpop.xlane.xlu0 %51 }
  0xb6   :  { %v55_v6 = vmul.f32 %v53_v3, %v52_v4 }
  0xb8   :  { %v62_v7 = vadd.f32 %v81_v5, %v55_v6 }
  0xba   :  { %63 = vst [vmem:[#allocation7] sm:$0xff] %v62_v7 }
  0xbb   :  { %140 = shalt.err (!%p137_p6)
}
  0xbc   :  { %s141_s19 = scalar_lea.hbm %s231_s4, 128 }
  0xbd   :  { %p142_p7 = scmp.ne.s32.totalorder %s231_s4, %s141_s19  ;;  %p145_p8 = scmp.lt.u32.totalorder %s141_s19, %s231_s4 }
  0xbf   :  { %p147_p9 = pnand %p145_p8, %p142_p7 }
  0xc1   :  { %150 = shalt.err (!%p147_p9)
}
  0xc2   :  { %73 = dma.vmem_to_hbm [thread:$0]  %s71_s17, 128, %s231_s4, [#allocation4]  }
  0xc3   :  { %155 = dma.done.wait [#allocation4], 128  }
  0xc4   :  { %156 = vsyncadd [#allocation4], 4294967168 }
  0xc5   :  { %77 = vsyncpa [#allocation3], 1 }
  0xc6   :  { %78 = vsyncpa [#allocation6], 1 }
  0xc7   :  { %79 = vsyncpa [#allocation4], 1 }

</bundles_post_ra>
